<compile_context>
chip_gen: v7x
topology: tpu7x:2x2x1
jax: 0.10.0
libtpu: 0.0.40
codegen_flags: <defaults>
</compile_context>

<pallas_src>
import functools

import jax
import jax.numpy as jnp
from jax.experimental import pallas as pl
from jax.experimental.pallas import tpu as pltpu

_MATMUL_DTYPE = jnp.bfloat16  # MXU operand dtype for the temporal FFN (f32 accumulation)


def _gelu_tanh(x):
    # TODO(synk): PyTorch nn.GELU() default is the exact erf form; erf has no
    # guaranteed Mosaic lowering, so the tanh approximation is used here (and in
    # the pure-JAX reference) -- max deviation ~1e-3 per element.
    c = 0.7978845608028654  # sqrt(2/pi)
    return 0.5 * x * (1.0 + jnp.tanh(c * (x + 0.044715 * (x * x * x))))


def _ffn_ffn_kernel(x_ref, w1v_ref, w2v_ref, bv_ref, w1t_ref, b1t_ref,
                    w2t_ref, dvec_ref, o_ref, *, n, block_b, eps):
    """One grid step processes `block_b` batch elements, i.e. (block_b*N, D) rows."""
    hv = 4 * n
    w1v = w1v_ref[...]                       # (4N, N)   conv (out, in) layout
    w2v = w2v_ref[...]                       # (N, 4N)
    b1v = bv_ref[0:hv, :]                    # (4N, 1) f32, broadcasts along D (lanes)
    b2v = bv_ref[hv:hv + n, :]               # (N, 1)  f32

    # ---- FeedForward over the variate axis N (Conv1d k=1 == left matmul) ------
    # Short, statically-unrolled loop over the batch elements of this block.
    y_rows = []
    for b in range(block_b):
        xb = x_ref[b * n:(b + 1) * n, :].astype(jnp.float32)        # (N, D)
        h1 = jnp.dot(w1v, xb.astype(w1v.dtype),
                     preferred_element_type=jnp.float32) + b1v      # (4N, D)
        h1 = _gelu_tanh(h1)
        f1 = jnp.dot(w2v, h1.astype(w2v.dtype),
                     preferred_element_type=jnp.float32) + b2v      # (N, D)
        y_rows.append(xb + f1)                                      # residual (f32)
    y = y_rows[0] if block_b == 1 else jnp.concatenate(y_rows, axis=0)   # (M, D)

    # ---- Residual + LayerNorm over D -------------------------------------------
    ln1w = dvec_ref[0:1, :]
    ln1b = dvec_ref[1:2, :]
    mean = jnp.mean(y, axis=-1, keepdims=True)
    var = jnp.mean((y - mean) * (y - mean), axis=-1, keepdims=True)
    y = (y - mean) * jax.lax.rsqrt(var + eps) * ln1w + ln1b

    # ---- FeedForward over the feature axis D on the flattened (M, D) slab ------
    h2 = jnp.dot(y.astype(w1t_ref.dtype), w1t_ref[...],
                 preferred_element_type=jnp.float32) + b1t_ref[...]      # (M, 4D)
    h2 = _gelu_tanh(h2)
    f2 = jnp.dot(h2.astype(w2t_ref.dtype), w2t_ref[...],
                 preferred_element_type=jnp.float32) + dvec_ref[4:5, :]  # (M, D)

    # ---- Residual + LayerNorm over D -------------------------------------------
    z = y + f2
    ln2w = dvec_ref[2:3, :]
    ln2b = dvec_ref[3:4, :]
    mean = jnp.mean(z, axis=-1, keepdims=True)
    var = jnp.mean((z - mean) * (z - mean), axis=-1, keepdims=True)
    out = (z - mean) * jax.lax.rsqrt(var + eps) * ln2w + ln2b

    # TODO(synk): when D % 128 != 0 a lane-dense (rows, 128) slab store would avoid
    # masked vst, but requires a minor-dim reshape (cross-lane relayout); omitted to
    # keep the lowering unconditionally supported.
    o_ref[...] = out.astype(o_ref.dtype)


def prepare_params(params):
    """One-time host-side re-layout (hoisted off the per-call path):
       * variate Conv1d weights kept in (out, in) layout -> left matmul; both
         variate biases merged into one column vector (broadcast along lanes),
       * temporal Conv1d weights pre-transposed -> right matmul, bf16 cast once,
       * LN1/LN2 params + temporal output bias merged into one (5, D) block,
       * variate matmuls stay f32 when N < 32 (K tiny -> MXU cost negligible)."""
    N = params["w2_var"].shape[0]
    D = params["ln1_w"].shape[0]
    Hv, Ht = 4 * N, 4 * D
    vdt = jnp.float32 if N < 32 else _MATMUL_DTYPE
    return {
        "n": N, "d": D,
        "w1v": params["w1_var"].astype(vdt),                              # (4N, N)
        "w2v": params["w2_var"].astype(vdt),                              # (N, 4N)
        "bv": jnp.concatenate([params["b1_var"], params["b2_var"]])
                 .reshape(Hv + N, 1).astype(jnp.float32),                 # (5N, 1)
        "w1t": params["w1_tmp"].T.astype(_MATMUL_DTYPE),                  # (D, 4D)
        "b1t": params["b1_tmp"].reshape(1, Ht).astype(jnp.float32),       # (1, 4D)
        "w2t": params["w2_tmp"].T.astype(_MATMUL_DTYPE),                  # (4D, D)
        "dvec": jnp.stack([params["ln1_w"], params["ln1_b"],
                           params["ln2_w"], params["ln2_b"],
                           params["b2_tmp"]], axis=0).astype(jnp.float32),  # (5, D)
    }


def _pick_block_b(B, N, target_rows=256):
    """Largest divisor of B with block_b*N <= target_rows (MXU M-dim target),
    keeping >= 2 grid steps when possible so both v7x TensorCores get work."""
    divisors = [d for d in range(1, B + 1) if B % d == 0]
    fits = [d for d in divisors if d * N <= target_rows] or [1]
    bt = max(fits)
    if B // bt < 2:
        two_plus = [d for d in fits if B // d >= 2]
        if two_plus:
            bt = max(two_plus)
    return bt


def trm_block_ffn_ffn(x, prep, *, eps=1e-5, block_b=None):
    """x: (B, N, D) float32. prep: output of prepare_params()."""
    B, N, D = x.shape
    assert N == prep["n"] and D == prep["d"], "params/input shape mismatch"
    Hv, Ht = 4 * N, 4 * D
    if block_b is None:
        block_b = _pick_block_b(B, N)
    assert B % block_b == 0
    grid = (B // block_b,)
    M = block_b * N                      # rows per grid step

    x2 = x.reshape(B * N, D)             # flat row slab; variate blocks are row-contiguous

    def cspec(shape):
        # Full-array, grid-constant block: block index never changes so the pipeline
        # does not re-DMA it across grid steps.
        # TODO(synk): single-buffer these via pipeline_mode=pl.Buffered(1) once that
        # is confirmed supported for top-level pallas_call BlockSpecs.
        return pl.BlockSpec(shape, lambda i, _s=len(shape): (0,) * _s)

    # Explicit VMEM budget (default scoped limit is only 16/32 MiB; v7x has 64 MiB/TC).
    weight_bytes = int(prep["w1v"].size * prep["w1v"].dtype.itemsize
                       + prep["w2v"].size * prep["w2v"].dtype.itemsize
                       + prep["w1t"].size * prep["w1t"].dtype.itemsize
                       + prep["w2t"].size * prep["w2t"].dtype.itemsize)
    vec_bytes = 4 * ((Hv + N) * 128 + 8 * Ht + 8 * max(D, 128))   # tile-padded vectors
    act_bytes = 4 * M * D                                          # one x/out block (f32)
    inter_bytes = 4 * (M * Ht + Hv * D + 4 * M * D)                # h2 + h1 + y/z/f1/f2
    est = 2 * (weight_bytes + vec_bytes) + 4 * act_bytes + inter_bytes
    vmem_limit = int(min(64 * 2 ** 20, max(16 * 2 ** 20, 2 * est)))

    cost = pl.CostEstimate(
        flops=int(16 * B * N * D * (N + D)),
        transcendentals=int(8 * B * N * D),
        bytes_accessed=int(2 * B * N * D * 4 + weight_bytes + vec_bytes))

    kernel = functools.partial(_ffn_ffn_kernel, n=N, block_b=block_b, eps=eps)

    out2 = pl.pallas_call(
        kernel,
        out_shape=jax.ShapeDtypeStruct((B * N, D), x.dtype),
        grid_spec=pltpu.PrefetchScalarGridSpec(
            num_scalar_prefetch=0,
            grid=grid,
            in_specs=[
                pl.BlockSpec((M, D), lambda i: (i, 0)),   # x rows for this block
                cspec((Hv, N)),        # w1_var   (out, in)
                cspec((N, Hv)),        # w2_var   (out, in)
                cspec((Hv + N, 1)),    # [b1_var ; b2_var] column
                cspec((D, Ht)),        # w1_tmp^T
                cspec((1, Ht)),        # b1_tmp row
                cspec((Ht, D)),        # w2_tmp^T
                cspec((5, D)),         # [ln1_w ; ln1_b ; ln2_w ; ln2_b ; b2_tmp]
            ],
            out_specs=pl.BlockSpec((M, D), lambda i: (i, 0)),
        ),
        compiler_params=pltpu.CompilerParams(
            dimension_semantics=("parallel",),
            vmem_limit_bytes=vmem_limit),
        cost_estimate=cost,
    )(x2, prep["w1v"], prep["w2v"], prep["bv"], prep["w1t"], prep["b1t"],
      prep["w2t"], prep["dvec"])
    return out2.reshape(B, N, D)


def _reference_jax(x, params, *, eps=1e-5):
    """Pure-JAX reference mirroring the PyTorch forward (eval mode), f32 math."""
    f1 = jnp.einsum("hn,bnd->bhd", params["w1_var"], x) + params["b1_var"][None, :, None]
    f1 = _gelu_tanh(f1)
    f1 = jnp.einsum("nh,bhd->bnd", params["w2_var"], f1) + params["b2_var"][None, :, None]
    y = x + f1
    mean = jnp.mean(y, -1, keepdims=True)
    var = jnp.mean((y - mean) ** 2, -1, keepdims=True)
    y = (y - mean) / jnp.sqrt(var + eps) * params["ln1_w"] + params["ln1_b"]
    f2 = _gelu_tanh(y @ params["w1_tmp"].T + params["b1_tmp"])
    f2 = f2 @ params["w2_tmp"].T + params["b2_tmp"]
    z = y + f2
    mean = jnp.mean(z, -1, keepdims=True)
    var = jnp.mean((z - mean) ** 2, -1, keepdims=True)
    return (z - mean) / jnp.sqrt(var + eps) * params["ln2_w"] + params["ln2_b"]


def init_params(key, N, D):
    """Mimics PyTorch Conv1d(k=1)/LayerNorm default init (kernel dim squeezed)."""
    ks = jax.random.split(key, 8)
    sN, s4N = 1.0 / jnp.sqrt(jnp.float32(N)), 1.0 / jnp.sqrt(jnp.float32(4 * N))
    sD, s4D = 1.0 / jnp.sqrt(jnp.float32(D)), 1.0 / jnp.sqrt(jnp.float32(4 * D))
    return {
        # feedforward_variate = FeedForward(N): Conv1d(N,4N,1), Conv1d(4N,N,1)
        "w1_var": jax.random.uniform(ks[0], (4 * N, N), jnp.float32, -sN, sN),
        "b1_var": jax.random.uniform(ks[1], (4 * N,), jnp.float32, -sN, sN),
        "w2_var": jax.random.uniform(ks[2], (N, 4 * N), jnp.float32, -s4N, s4N),
        "b2_var": jax.random.uniform(ks[3], (N,), jnp.float32, -s4N, s4N),
        "ln1_w": jnp.ones((D,), jnp.float32),
        "ln1_b": jnp.zeros((D,), jnp.float32),
        # feedforward_temporal = FeedForward(D): Conv1d(D,4D,1), Conv1d(4D,D,1)
        "w1_tmp": jax.random.uniform(ks[4], (4 * D, D), jnp.float32, -sD, sD),
        "b1_tmp": jax.random.uniform(ks[5], (4 * D,), jnp.float32, -sD, sD),
        "w2_tmp": jax.random.uniform(ks[6], (D, 4 * D), jnp.float32, -s4D, s4D),
        "b2_tmp": jax.random.uniform(ks[7], (D,), jnp.float32, -s4D, s4D),
        "ln2_w": jnp.ones((D,), jnp.float32),
        "ln2_b": jnp.zeros((D,), jnp.float32),
    }


if __name__ == "__main__":
    key = jax.random.PRNGKey(0)
    k_x, k_p = jax.random.split(key)

    B, N, D = 4, 8, 32            # (proj_dim is unused by the module's forward)
    x = jax.random.normal(k_x, (B, N, D), jnp.float32)
    params = init_params(k_p, N, D)

    prep = prepare_params(params)         # one-time re-layout, off the call path
    out = trm_block_ffn_ffn(x, prep)      # block_b=2 -> grid of 2 parallel steps
    out = jax.block_until_ready(out)

    ref = _reference_jax(x, params)
    assert out.shape == (B, N, D)
    # bf16 MXU operands for the temporal FFN (f32 accumulation) vs pure-f32 reference.
    assert jnp.max(jnp.abs(out - ref)) < 3e-2, "mismatch vs. reference"

    print("KERNEL_OK")
</pallas_src>

<mosaic_0001>
module attributes {stable_mosaic.version = 11 : i64} {
  func.func @_ffn_ffn_kernel(%arg0: i32, %arg1: memref<16x32xf32, #tpu.memory_space<vmem>>, %arg2: memref<32x8xf32, #tpu.memory_space<vmem>>, %arg3: memref<8x32xf32, #tpu.memory_space<vmem>>, %arg4: memref<40x1xf32, #tpu.memory_space<vmem>>, %arg5: memref<32x128xbf16, #tpu.memory_space<vmem>>, %arg6: memref<1x128xf32, #tpu.memory_space<vmem>>, %arg7: memref<128x32xbf16, #tpu.memory_space<vmem>>, %arg8: memref<5x32xf32, #tpu.memory_space<vmem>>, %arg9: memref<16x32xf32, #tpu.memory_space<vmem>>) attributes {dimension_semantics = [#tpu.dimension_semantics<parallel>], iteration_bounds = array<i64: 2>, scalar_prefetch = 0 : i64, scratch_operands = 0 : i64, tpu.core_type = #tpu.core_type<tc>, window_params = [{transform_indices = @transform_0, window_bounds = array<i64: 16, 32>}, {pipeline_mode = #tpu.pipeline_mode<synchronous>, transform_indices = @transform_1, window_bounds = array<i64: 32, 8>}, {pipeline_mode = #tpu.pipeline_mode<synchronous>, transform_indices = @transform_2, window_bounds = array<i64: 8, 32>}, {pipeline_mode = #tpu.pipeline_mode<synchronous>, transform_indices = @transform_3, window_bounds = array<i64: 40, 1>}, {pipeline_mode = #tpu.pipeline_mode<synchronous>, transform_indices = @transform_4, window_bounds = array<i64: 32, 128>}, {pipeline_mode = #tpu.pipeline_mode<synchronous>, transform_indices = @transform_5, window_bounds = array<i64: 1, 128>}, {pipeline_mode = #tpu.pipeline_mode<synchronous>, transform_indices = @transform_6, window_bounds = array<i64: 128, 32>}, {pipeline_mode = #tpu.pipeline_mode<synchronous>, transform_indices = @transform_7, window_bounds = array<i64: 5, 32>}, {transform_indices = @transform_8, window_bounds = array<i64: 16, 32>}]} {
    %c0 = arith.constant 0 : index
    %c0_0 = arith.constant 0 : index
    %0 = vector.load %arg2[%c0, %c0_0] : memref<32x8xf32, #tpu.memory_space<vmem>>, vector<32x8xf32>
    %c0_1 = arith.constant 0 : index
    %c0_2 = arith.constant 0 : index
    %1 = vector.load %arg3[%c0_1, %c0_2] : memref<8x32xf32, #tpu.memory_space<vmem>>, vector<8x32xf32>
    %c0_3 = arith.constant 0 : index
    %c0_4 = arith.constant 0 : index
    %2 = vector.load %arg4[%c0_3, %c0_4] : memref<40x1xf32, #tpu.memory_space<vmem>>, vector<32x1xf32>
    %c32 = arith.constant 32 : index
    %c0_5 = arith.constant 0 : index
    %3 = vector.load %arg4[%c32, %c0_5] : memref<40x1xf32, #tpu.memory_space<vmem>>, vector<8x1xf32>
    %c0_6 = arith.constant 0 : index
    %c0_7 = arith.constant 0 : index
    %4 = vector.load %arg1[%c0_6, %c0_7] : memref<16x32xf32, #tpu.memory_space<vmem>>, vector<8x32xf32>
    %cst = arith.constant dense<0.000000e+00> : vector<32x32xf32>
    %5 = tpu.matmul %0, %4, %cst {dimension_numbers = #tpu.dot_dimension_numbers<[1], [0], [0], [1], [0, 0, 1, 1], [], []>} : vector<32x8xf32>, vector<8x32xf32>, vector<32x32xf32> -> vector<32x32xf32>
    %6 = vector.broadcast %2 : vector<32x1xf32> to vector<32x32xf32>
    %7 = arith.addf %5, %6 : vector<32x32xf32>
    %cst_8 = arith.constant 5.000000e-01 : f32
    %8 = vector.broadcast %cst_8 : f32 to vector<32x32xf32>
    %9 = arith.mulf %8, %7 : vector<32x32xf32>
    %10 = arith.mulf %7, %7 : vector<32x32xf32>
    %11 = arith.mulf %10, %7 : vector<32x32xf32>
    %cst_9 = arith.constant 4.471500e-02 : f32
    %12 = vector.broadcast %cst_9 : f32 to vector<32x32xf32>
    %13 = arith.mulf %12, %11 : vector<32x32xf32>
    %14 = arith.addf %7, %13 : vector<32x32xf32>
    %cst_10 = arith.constant 0.797884583 : f32
    %15 = vector.broadcast %cst_10 : f32 to vector<32x32xf32>
    %16 = arith.mulf %15, %14 : vector<32x32xf32>
    %17 = math.tanh %16 : vector<32x32xf32>
    %cst_11 = arith.constant 1.000000e+00 : f32
    %18 = vector.broadcast %cst_11 : f32 to vector<32x32xf32>
    %19 = arith.addf %18, %17 : vector<32x32xf32>
    %20 = arith.mulf %9, %19 : vector<32x32xf32>
    %cst_12 = arith.constant dense<0.000000e+00> : vector<8x32xf32>
    %21 = tpu.matmul %1, %20, %cst_12 {dimension_numbers = #tpu.dot_dimension_numbers<[1], [0], [0], [1], [0, 0, 1, 1], [], []>} : vector<8x32xf32>, vector<32x32xf32>, vector<8x32xf32> -> vector<8x32xf32>
    %22 = vector.broadcast %3 : vector<8x1xf32> to vector<8x32xf32>
    %23 = arith.addf %21, %22 : vector<8x32xf32>
    %24 = arith.addf %4, %23 : vector<8x32xf32>
    %c8 = arith.constant 8 : index
    %c0_13 = arith.constant 0 : index
    %25 = vector.load %arg1[%c8, %c0_13] : memref<16x32xf32, #tpu.memory_space<vmem>>, vector<8x32xf32>
    %cst_14 = arith.constant dense<0.000000e+00> : vector<32x32xf32>
    %26 = tpu.matmul %0, %25, %cst_14 {dimension_numbers = #tpu.dot_dimension_numbers<[1], [0], [0], [1], [0, 0, 1, 1], [], []>} : vector<32x8xf32>, vector<8x32xf32>, vector<32x32xf32> -> vector<32x32xf32>
    %27 = vector.broadcast %2 : vector<32x1xf32> to vector<32x32xf32>
    %28 = arith.addf %26, %27 : vector<32x32xf32>
    %cst_15 = arith.constant 5.000000e-01 : f32
    %29 = vector.broadcast %cst_15 : f32 to vector<32x32xf32>
    %30 = arith.mulf %29, %28 : vector<32x32xf32>
    %31 = arith.mulf %28, %28 : vector<32x32xf32>
    %32 = arith.mulf %31, %28 : vector<32x32xf32>
    %cst_16 = arith.constant 4.471500e-02 : f32
    %33 = vector.broadcast %cst_16 : f32 to vector<32x32xf32>
    %34 = arith.mulf %33, %32 : vector<32x32xf32>
    %35 = arith.addf %28, %34 : vector<32x32xf32>
    %cst_17 = arith.constant 0.797884583 : f32
    %36 = vector.broadcast %cst_17 : f32 to vector<32x32xf32>
    %37 = arith.mulf %36, %35 : vector<32x32xf32>
    %38 = math.tanh %37 : vector<32x32xf32>
    %cst_18 = arith.constant 1.000000e+00 : f32
    %39 = vector.broadcast %cst_18 : f32 to vector<32x32xf32>
    %40 = arith.addf %39, %38 : vector<32x32xf32>
    %41 = arith.mulf %30, %40 : vector<32x32xf32>
    %cst_19 = arith.constant dense<0.000000e+00> : vector<8x32xf32>
    %42 = tpu.matmul %1, %41, %cst_19 {dimension_numbers = #tpu.dot_dimension_numbers<[1], [0], [0], [1], [0, 0, 1, 1], [], []>} : vector<8x32xf32>, vector<32x32xf32>, vector<8x32xf32> -> vector<8x32xf32>
    %43 = vector.broadcast %3 : vector<8x1xf32> to vector<8x32xf32>
    %44 = arith.addf %42, %43 : vector<8x32xf32>
    %45 = arith.addf %25, %44 : vector<8x32xf32>
    %46 = tpu.concatenate %24, %45 in 0 : vector<8x32xf32>, vector<8x32xf32> -> vector<16x32xf32>
    %c0_20 = arith.constant 0 : index
    %c0_21 = arith.constant 0 : index
    %47 = vector.load %arg8[%c0_20, %c0_21] : memref<5x32xf32, #tpu.memory_space<vmem>>, vector<1x32xf32>
    %c1 = arith.constant 1 : index
    %c0_22 = arith.constant 0 : index
    %48 = vector.load %arg8[%c1, %c0_22] : memref<5x32xf32, #tpu.memory_space<vmem>>, vector<1x32xf32>
    %cst_23 = arith.constant dense<0.000000e+00> : vector<16xf32>
    %49 = vector.multi_reduction <add>, %46, %cst_23 [1] : vector<16x32xf32> to vector<16xf32>
    %50 = vector.shape_cast %49 : vector<16xf32> to vector<16x1xf32>
    %cst_24 = arith.constant 3.200000e+01 : f32
    %51 = vector.broadcast %cst_24 : f32 to vector<16x1xf32>
    %52 = arith.divf %50, %51 : vector<16x1xf32>
    %53 = vector.broadcast %52 : vector<16x1xf32> to vector<16x32xf32>
    %54 = arith.subf %46, %53 : vector<16x32xf32>
    %55 = vector.broadcast %52 : vector<16x1xf32> to vector<16x32xf32>
    %56 = arith.subf %46, %55 : vector<16x32xf32>
    %57 = arith.mulf %54, %56 : vector<16x32xf32>
    %cst_25 = arith.constant dense<0.000000e+00> : vector<16xf32>
    %58 = vector.multi_reduction <add>, %57, %cst_25 [1] : vector<16x32xf32> to vector<16xf32>
    %59 = vector.shape_cast %58 : vector<16xf32> to vector<16x1xf32>
    %cst_26 = arith.constant 3.200000e+01 : f32
    %60 = vector.broadcast %cst_26 : f32 to vector<16x1xf32>
    %61 = arith.divf %59, %60 : vector<16x1xf32>
    %62 = vector.broadcast %52 : vector<16x1xf32> to vector<16x32xf32>
    %63 = arith.subf %46, %62 : vector<16x32xf32>
    %cst_27 = arith.constant 9.99999974E-6 : f32
    %64 = vector.broadcast %cst_27 : f32 to vector<16x1xf32>
    %65 = arith.addf %61, %64 : vector<16x1xf32>
    %66 = math.rsqrt %65 : vector<16x1xf32>
    %67 = vector.broadcast %66 : vector<16x1xf32> to vector<16x32xf32>
    %68 = arith.mulf %63, %67 : vector<16x32xf32>
    %69 = vector.broadcast %47 : vector<1x32xf32> to vector<16x32xf32>
    %70 = arith.mulf %68, %69 : vector<16x32xf32>
    %71 = vector.broadcast %48 : vector<1x32xf32> to vector<16x32xf32>
    %72 = arith.addf %70, %71 : vector<16x32xf32>
    %73 = arith.truncf %72 : vector<16x32xf32> to vector<16x32xbf16>
    %c0_28 = arith.constant 0 : index
    %c0_29 = arith.constant 0 : index
    %74 = vector.load %arg5[%c0_28, %c0_29] : memref<32x128xbf16, #tpu.memory_space<vmem>>, vector<32x128xbf16>
    %cst_30 = arith.constant dense<0.000000e+00> : vector<16x128xf32>
    %75 = tpu.matmul %73, %74, %cst_30 {dimension_numbers = #tpu.dot_dimension_numbers<[1], [0], [0], [1], [0, 0, 1, 1], [], []>} : vector<16x32xbf16>, vector<32x128xbf16>, vector<16x128xf32> -> vector<16x128xf32>
    %c0_31 = arith.constant 0 : index
    %c0_32 = arith.constant 0 : index
    %76 = vector.load %arg6[%c0_31, %c0_32] : memref<1x128xf32, #tpu.memory_space<vmem>>, vector<1x128xf32>
    %77 = vector.broadcast %76 : vector<1x128xf32> to vector<16x128xf32>
    %78 = arith.addf %75, %77 : vector<16x128xf32>
    %cst_33 = arith.constant 5.000000e-01 : f32
    %79 = vector.broadcast %cst_33 : f32 to vector<16x128xf32>
    %80 = arith.mulf %79, %78 : vector<16x128xf32>
    %81 = arith.mulf %78, %78 : vector<16x128xf32>
    %82 = arith.mulf %81, %78 : vector<16x128xf32>
    %cst_34 = arith.constant 4.471500e-02 : f32
    %83 = vector.broadcast %cst_34 : f32 to vector<16x128xf32>
    %84 = arith.mulf %83, %82 : vector<16x128xf32>
    %85 = arith.addf %78, %84 : vector<16x128xf32>
    %cst_35 = arith.constant 0.797884583 : f32
    %86 = vector.broadcast %cst_35 : f32 to vector<16x128xf32>
    %87 = arith.mulf %86, %85 : vector<16x128xf32>
    %88 = math.tanh %87 : vector<16x128xf32>
    %cst_36 = arith.constant 1.000000e+00 : f32
    %89 = vector.broadcast %cst_36 : f32 to vector<16x128xf32>
    %90 = arith.addf %89, %88 : vector<16x128xf32>
    %91 = arith.mulf %80, %90 : vector<16x128xf32>
    %92 = arith.truncf %91 : vector<16x128xf32> to vector<16x128xbf16>
    %c0_37 = arith.constant 0 : index
    %c0_38 = arith.constant 0 : index
    %93 = vector.load %arg7[%c0_37, %c0_38] : memref<128x32xbf16, #tpu.memory_space<vmem>>, vector<128x32xbf16>
    %cst_39 = arith.constant dense<0.000000e+00> : vector<16x32xf32>
    %94 = tpu.matmul %92, %93, %cst_39 {dimension_numbers = #tpu.dot_dimension_numbers<[1], [0], [0], [1], [0, 0, 1, 1], [], []>} : vector<16x128xbf16>, vector<128x32xbf16>, vector<16x32xf32> -> vector<16x32xf32>
    %c4 = arith.constant 4 : index
    %c0_40 = arith.constant 0 : index
    %95 = vector.load %arg8[%c4, %c0_40] : memref<5x32xf32, #tpu.memory_space<vmem>>, vector<1x32xf32>
    %96 = vector.broadcast %95 : vector<1x32xf32> to vector<16x32xf32>
    %97 = arith.addf %94, %96 : vector<16x32xf32>
    %98 = arith.addf %72, %97 : vector<16x32xf32>
    %c2 = arith.constant 2 : index
    %c0_41 = arith.constant 0 : index
    %99 = vector.load %arg8[%c2, %c0_41] : memref<5x32xf32, #tpu.memory_space<vmem>>, vector<1x32xf32>
    %c3 = arith.constant 3 : index
    %c0_42 = arith.constant 0 : index
    %100 = vector.load %arg8[%c3, %c0_42] : memref<5x32xf32, #tpu.memory_space<vmem>>, vector<1x32xf32>
    %cst_43 = arith.constant dense<0.000000e+00> : vector<16xf32>
    %101 = vector.multi_reduction <add>, %98, %cst_43 [1] : vector<16x32xf32> to vector<16xf32>
    %102 = vector.shape_cast %101 : vector<16xf32> to vector<16x1xf32>
    %cst_44 = arith.constant 3.200000e+01 : f32
    %103 = vector.broadcast %cst_44 : f32 to vector<16x1xf32>
    %104 = arith.divf %102, %103 : vector<16x1xf32>
    %105 = vector.broadcast %104 : vector<16x1xf32> to vector<16x32xf32>
    %106 = arith.subf %98, %105 : vector<16x32xf32>
    %107 = vector.broadcast %104 : vector<16x1xf32> to vector<16x32xf32>
    %108 = arith.subf %98, %107 : vector<16x32xf32>
    %109 = arith.mulf %106, %108 : vector<16x32xf32>
    %cst_45 = arith.constant dense<0.000000e+00> : vector<16xf32>
    %110 = vector.multi_reduction <add>, %109, %cst_45 [1] : vector<16x32xf32> to vector<16xf32>
    %111 = vector.shape_cast %110 : vector<16xf32> to vector<16x1xf32>
    %cst_46 = arith.constant 3.200000e+01 : f32
    %112 = vector.broadcast %cst_46 : f32 to vector<16x1xf32>
    %113 = arith.divf %111, %112 : vector<16x1xf32>
    %114 = vector.broadcast %104 : vector<16x1xf32> to vector<16x32xf32>
    %115 = arith.subf %98, %114 : vector<16x32xf32>
    %cst_47 = arith.constant 9.99999974E-6 : f32
    %116 = vector.broadcast %cst_47 : f32 to vector<16x1xf32>
    %117 = arith.addf %113, %116 : vector<16x1xf32>
    %118 = math.rsqrt %117 : vector<16x1xf32>
    %119 = vector.broadcast %118 : vector<16x1xf32> to vector<16x32xf32>
    %120 = arith.mulf %115, %119 : vector<16x32xf32>
    %121 = vector.broadcast %99 : vector<1x32xf32> to vector<16x32xf32>
    %122 = arith.mulf %120, %121 : vector<16x32xf32>
    %123 = vector.broadcast %100 : vector<1x32xf32> to vector<16x32xf32>
    %124 = arith.addf %122, %123 : vector<16x32xf32>
    %c0_48 = arith.constant 0 : index
    %c0_49 = arith.constant 0 : index
    %125 = vector.load %arg9[%c0_48, %c0_49] : memref<16x32xf32, #tpu.memory_space<vmem>>, vector<16x32xf32>
    tpu.vector_store %arg9[%c0_48, %c0_49], %124 {strides = array<i32>} : memref<16x32xf32, #tpu.memory_space<vmem>>, vector<16x32xf32>,
    return
  }
  func.func @transform_0(%arg0: i32) -> (i32, i32) {
    %c0_i32 = arith.constant 0 : i32
    %c0_i32_0 = arith.constant 0 : i32
    return %arg0, %c0_i32 : i32, i32
  }
  func.func @transform_1(%arg0: i32) -> (i32, i32) {
    %c0_i32 = arith.constant 0 : i32
    %c0_i32_0 = arith.constant 0 : i32
    %c0_i32_1 = arith.constant 0 : i32
    return %c0_i32, %c0_i32_0 : i32, i32
  }
  func.func @transform_2(%arg0: i32) -> (i32, i32) {
    %c0_i32 = arith.constant 0 : i32
    %c0_i32_0 = arith.constant 0 : i32
    %c0_i32_1 = arith.constant 0 : i32
    return %c0_i32, %c0_i32_0 : i32, i32
  }
  func.func @transform_3(%arg0: i32) -> (i32, i32) {
    %c0_i32 = arith.constant 0 : i32
    %c0_i32_0 = arith.constant 0 : i32
    %c0_i32_1 = arith.constant 0 : i32
    return %c0_i32, %c0_i32_0 : i32, i32
  }
  func.func @transform_4(%arg0: i32) -> (i32, i32) {
    %c0_i32 = arith.constant 0 : i32
    %c0_i32_0 = arith.constant 0 : i32
    %c0_i32_1 = arith.constant 0 : i32
    return %c0_i32, %c0_i32_0 : i32, i32
  }
  func.func @transform_5(%arg0: i32) -> (i32, i32) {
    %c0_i32 = arith.constant 0 : i32
    %c0_i32_0 = arith.constant 0 : i32
    %c0_i32_1 = arith.constant 0 : i32
    return %c0_i32, %c0_i32_0 : i32, i32
  }
  func.func @transform_6(%arg0: i32) -> (i32, i32) {
    %c0_i32 = arith.constant 0 : i32
    %c0_i32_0 = arith.constant 0 : i32
    %c0_i32_1 = arith.constant 0 : i32
    return %c0_i32, %c0_i32_0 : i32, i32
  }
  func.func @transform_7(%arg0: i32) -> (i32, i32) {
    %c0_i32 = arith.constant 0 : i32
    %c0_i32_0 = arith.constant 0 : i32
    %c0_i32_1 = arith.constant 0 : i32
    return %c0_i32, %c0_i32_0 : i32, i32
  }
  func.func @transform_8(%arg0: i32) -> (i32, i32) {
    %c0_i32 = arith.constant 0 : i32
    %c0_i32_0 = arith.constant 0 : i32
    return %arg0, %c0_i32 : i32, i32
  }
}

</mosaic_0001>

<bundles_post_ra>
// kernel: tpu_custom_call.1
= control target key start
LH: loop header
LB: loop body
LE: loop exit
PB: predicated region body
PF: predicated region fallthrough
CT: control target
= control target key end

     0   :  { %13 = vsyncpa [#allocation3], 0  ;;  %s1740_s0 = inlined_call_operand.vmem [shape: f32[32,32], index: 0, kind: input, shape index: {}]   ;;  %s1741_s1 = inlined_call_operand.vmem [shape: f32[32,8], index: 1, kind: input, shape index: {}]   ;;  %s1742_s2 = inlined_call_operand.vmem [shape: f32[8,32], index: 2, kind: input, shape index: {}]   ;;  %s1743_s3 = inlined_call_operand.vmem [shape: f32[40,1], index: 3, kind: input, shape index: {}]   ;;  %s1744_s4 = inlined_call_operand.vmem [shape: bf16[32,128], index: 4, kind: input, shape index: {}]   ;;  %s1745_s5 = inlined_call_operand.vmem [shape: f32[1,128], index: 5, kind: input, shape index: {}]   ;;  %s1746_s6 = inlined_call_operand.vmem [shape: bf16[128,32], index: 6, kind: input, shape index: {}]   ;;  %s1747_s7 = inlined_call_operand.vmem [shape: f32[5,32], index: 7, kind: input, shape index: {}]   ;;  %s1748_s8 = inlined_call_operand.hbm [shape: f32[32,32], index: 8, kind: output, shape index: {}]  }
   0x1   :  { %15 = vsyncpa [#allocation3 + $0x1], 0  ;;  %s1455_s27 = smov 0   ;;  %s1457_s28 = smov 0  }
   0x2   :  { %s1459_s29 = smov 0   ;;  %s1461_s30 = smov 0  }
   0x3 LB: > { %s1476_s9 = sadd.s32 4294967295, %s1401_s30   ;;  %s1104_s10 = sadd.s32 4294967294, %s1401_s30   ;;  %s1401_s30 = sphi %s1461_s30, %s1754_s30   ;;  %s1397_s29 = sphi %s1459_s29, %s1753_s29   ;;  %s1393_s28 = sphi %s1457_s28, %s1752_s28   ;;  %s1389_s27 = sphi %s1455_s27, %s1751_s27  }
   0x4   : > { %s1480_s11 = sadd.s32 1, %s1401_s30   ;;  %s201_s12 = sadd.s32 1, %s1397_s29 }
   0x5   : > { %s198_s13 = ssub.s32 %s1401_s30, %s1480_s11  ;;  %p211_p0 = scmp.ne.s32.totalorder %s1397_s29, %s1393_s28 }
   0x6   : > { %p199_p1 = scmp.eq.s32.totalorder %s198_s13, 0  ;;  %p212_p2 = scmp.eq.s32.totalorder %s1476_s9, 1 }
   0x7   : > { %p217_p3 = scmp.ne.s32.totalorder %s1393_s28, %s1389_s27  ;;  %p218_p4 = scmp.eq.s32.totalorder %s1104_s10, 1 }
   0x8   : > { %s1491_s14 = scalar_select %p199_p1, %s1397_s29, %s201_s12  }
   0x9   : > { %p1493_p5 = por %p212_p2, %p211_p0  ;;  %p1497_p6 = por %p218_p4, %p217_p3 }
   0xa   : > { %p1107_p7 = scmp.ge.s32.totalorder %s1401_s30, 1  ;;  %p266_p8 = scmp.lt.s32.totalorder %s1401_s30, 3 }
   0xc   : > { %p267_p9 = pnand %p1107_p7, %p266_p8 }
   0xd   : > { %s1109_s17 = sshll.u32 (!%p267_p9), %s1476_s9, 1  ;;  %v1507_v0 = vld [vmem:[%s1741_s1] sm:$0xff] (!%p267_p9)  ;;  %vm339_vm0 = vcmask (!%p267_p9), 64512   ;;  %v1403_v1 = vmov (!%p267_p9), 0   ;;  %v314_v3 = vld [vmem:[%s1743_s3 + $0x8] sm:$0xff] (!%p267_p9)  ;;  %v315_v4 = vld [vmem:[%s1743_s3 + $0x10] sm:$0xff] (!%p267_p9) }
   0xe   : > { %270 = sbr.rel (%p267_p9) target bundleno = 1849 (0x739), region = 52  ;;  %p301_p10 = scmp.lt.s32.totalorder (!%p267_p9), %s1109_s17, 3  ;;  %1178 = vmatprep.mubr.msk.f32.mxu0 (!%p267_p9), %vm339_vm0, %v1507_v0  ;;  %1299 = vset.pattern.permute.xlu0 (!%p267_p9), %v1403_v1  ;;  %v313_v2 = vld [vmem:[%s1743_s3] sm:$0xff] (!%p267_p9)  ;;  %v316_v5 = vld [vmem:[%s1743_s3 + $0x18] sm:$0xff] (!%p267_p9)  ;;  %v1526_v6 = vld [vmem:[%s1741_s1 + $0x8] sm:$0xff] (!%p267_p9)  ;;  %v1404_v11 = vmov (!%p267_p9), 0.0|0.0  }
   0xf   : > { %321 = vperm.xlu0 (!%p267_p9), %1299, %v313_v2   ;;  %1300 = vset.pattern.permute.xlu1 (!%p267_p9), %v1403_v1  ;;  %v317_v7 = vld [vmem:[%s1743_s3 + $0x20] sm:$0xff] (!%p267_p9)  ;;  %v1539_v8 = vld [vmem:[%s1741_s1 + $0x10] sm:$0xff] (!%p267_p9)  ;;  %v1553_v10 = vld [vmem:[%s1741_s1 + $0x18] sm:$0xff] (!%p267_p9)  ;;  %vm1405_vm1 = vmmov (!%p267_p9), 0   ;;  %v1406_v12 = vmov (!%p267_p9), 0.0   ;;  %vm478_vm2 = vcmask (!%p267_p9), 261120  }
  0x10   : > { %331 = vperm.xlu1 (!%p267_p9), %1300, %v315_v4   ;;  %1222 = vmatprep.subr.bf16.mxu1 (!%p267_p9), %v1406_v12  ;;  %v1582_v1 = vld [vmem:[%s1742_s2] sm:$0xff] (!%p267_p9)  ;;  %s297_s19 = sand.u32 (!%p267_p9), 1, %s1393_s28   ;;  %s1143_s25 = sshll.u32 (!%p267_p9), %s1476_s9, 8 }
  0x11   : > { %1238 = vmatprep.mubr.msk.bf16.mxu1 (!%p267_p9), %vm1405_vm1, %v1406_v12  ;;  %s1108_s20 = sshll.u32 (!%p267_p9), %s297_s19, 4  ;;  %s1693_s13 = scalar_lea.hbm (!%p267_p9), %s1748_s8, %s1143_s25 }
  0x12   : > { %s1699_s9 = scalar_lea.sflag (!%p267_p9), [#allocation3], %s297_s19 }
  0x13   : > { %326 = vperm.xlu0 (!%p267_p9), %1299, %v314_v3  }
  0x14   : > { %336 = vperm.xlu1 (!%p267_p9), %1300, %v316_v5  }
  0x15   : > { %s1756_s17 = smov (!%p301_p10, %s1109_s17), 3 }
  0x16   : > { %s1110_s12 = sshll.u32 %s1756_s17, 3  ;;  %s299_s17 = scalar_lea.vmem [#allocation2], %s1108_s20 }
  0x17   : > { %s1534_s23 = scalar_lea.vmem %s1740_s0, %s1110_s12  ;;  %475 = vperm.xlu0 %1299, %v317_v7   ;;  %s1042_s26 = sshll.u32 %s299_s17, 4  ;;  %s1695_s26 = int_to_ptr.vmem [resolvable:$true] %s1042_s26 }
  0x18   : > { %v1542_v9 = vld [vmem:[%s1534_s23] sm:$0xff]  ;;  %v1577_v63 = vld [vmem:[%s1534_s23 + $0x8] sm:$0xff]  ;;  %s1339_s18 = scalar_lea.vmem %s1695_s26, 256  ;;  %s1407_s20 = smov [#allocation2]  }
  0x19   : > { %1176 = vmatprep.subr.mxu0 %v1542_v9  ;;  %p1340_p11 = scmp.ne.s32.totalorder %s1695_s26, %s1339_s18  ;;  %s1343_s21 = sshll.u32 %s1407_s20, 4  ;;  %s1344_s21 = int_to_ptr.vmem [resolvable:$false] %s1343_s21 }
  0x1a   : > { %1177 = vmatpush3.msra.mxu0 %v1542_v9  ;;  %s1345_s22 = scalar_lea.vmem %s1344_s21, 512  ;;  %p1346_p0 = scmp.lt.s32.totalorder %s1695_s26, %s1344_s21 }
  0x1b   : > { %1179 = vmatmul.mubr.msk.f32.vlgmr.msra.gmra.mrb[0].mxu0 %vm339_vm0, %v1526_v6  ;;  %1242 = vmatprep.subr.bf16.mxu0 %v1404_v11  ;;  %p1341_p12 = pnand %p1340_p11, %p1493_p5  ;;  %p1347_p1 = scmp.lt.s32.totalorder %s1345_s22, %s1339_s18 }
  0x1c   : > { %1181 = vmatprep.mubr.msk.f32.mxu0 %vm339_vm0, %v1539_v8 }
  0x1d   : > { %p1342_p13 = pneg %p1341_p12  ;;  %p1348_p2 = por %p1347_p1, %p1346_p0 }
  0x1f   : > { %1182 = vmatmul.mubr.msk.f32.gmra.mrb[2].mxu0 %vm339_vm0, %v1553_v10  ;;  %p1349_p3 = pnand %p1348_p2, %p1342_p13 }
  0x20   : > { %1192 = vmatprep.mubr.msk.f32.mxu0 %vm1405_vm1, %v1406_v12 }
  0x8e   : > { %v1563_v13 = vpop.permute.xlu0 %321 }
  0x8f   : > { %v1565_v14 = vpop.permute.xlu1 %331 }
  0x92   : > { %v1567_v15 = vpop.permute.xlu0 %326 }
  0x93   : > { %v1571_v21 = vpop.permute.xlu1 %336 }
  0x96   : > { %v1599_v2 = vpop.permute.xlu0 %475 }
  0xee   : > { %v1180_v16 = vpop.f32.mrb[0].mxu0 }
  0xef   : > { %v424_v17 = vadd.f32 %v1180_v16, %v1567_v15  ;;  %v418_v18 = vpop.f32.mrb[1].mxu0 }
  0xf0   : > { %v419_v19 = vadd.f32 %v418_v18, %v1563_v13 }
  0xf1   : > { %v442_v20 = vmul.f32 %v424_v17, %v424_v17  ;;  %v438_v47 = vmul.f32 0.5, %v424_v17 }
  0xf2   : > { %v441_v22 = vmul.f32 %v419_v19, %v419_v19  ;;  %v1183_v23 = vpop.f32.mrb[2].mxu0  ;;  %v437_v49 = vmul.f32 0.5, %v419_v19 }
  0xf3   : > { %v446_v24 = vmul.f32 %v442_v20, %v424_v17  ;;  %v434_v25 = vadd.f32 %v1183_v23, %v1571_v21  ;;  %v428_v26 = vpop.f32.mrb[3].mxu0 }
  0xf4   : > { %v445_v27 = vmul.f32 %v441_v22, %v419_v19  ;;  %v429_v28 = vadd.f32 %v428_v26, %v1565_v14 }
  0xf5   : > { %v450_v29 = vmul.f32 0.044715, %v446_v24  ;;  %v444_v30 = vmul.f32 %v434_v25, %v434_v25  ;;  %v440_v55 = vmul.f32 0.5, %v434_v25 }
  0xf6   : > { %v449_v31 = vmul.f32 0.044715, %v445_v27  ;;  %v443_v32 = vmul.f32 %v429_v28, %v429_v28  ;;  %v439_v57 = vmul.f32 0.5, %v429_v28 }
  0xf7   : > { %v454_v33 = vadd.f32 %v450_v29, %v424_v17  ;;  %v448_v34 = vmul.f32 %v444_v30, %v434_v25 }
  0xf8   : > { %v453_v35 = vadd.f32 %v449_v31, %v419_v19  ;;  %v447_v36 = vmul.f32 %v443_v32, %v429_v28 }
  0xf9   : > { %v458_v37 = vmul.f32 0.7978846, %v454_v33  ;;  %v452_v38 = vmul.f32 0.044715, %v448_v34 }
  0xfa   : > { %v457_v39 = vmul.f32 0.7978846, %v453_v35  ;;  %v451_v40 = vmul.f32 0.044715, %v447_v36 }
  0xfb   : > { %1311 = vtanh.f32 %v458_v37  ;;  %v456_v41 = vadd.f32 %v452_v38, %v434_v25 }
  0xfc   : > { %1313 = vtanh.f32 %v457_v39  ;;  %v455_v42 = vadd.f32 %v451_v40, %v429_v28 }
  0xfd   : > { %v460_v43 = vmul.f32 0.7978846, %v456_v41 }
  0xfe   : > { %v459_v44 = vmul.f32 0.7978846, %v455_v42 }
  0xff   : > { %1315 = vtanh.f32 %v460_v43 }
 0x100   : > { %1317 = vtanh.f32 %v459_v44 }
 0x105   : > { %v1312_v45 = vpop.eup %1311 }
 0x106   : > { %v1314_v46 = vpop.eup %1313  ;;  %v466_v48 = vadd.f32 1.0, %v1312_v45 }
 0x107   : > { %v465_v50 = vadd.f32 1.0, %v1314_v46 }
 0x108   : > { %v470_v51 = vmul.f32 %v466_v48, %v438_v47 }
 0x109   : > { %v1316_v52 = vpop.eup %1315  ;;  %v469_v53 = vmul.f32 %v465_v50, %v437_v49 }
 0x10a   : > { %v1318_v54 = vpop.eup %1317  ;;  %v468_v56 = vadd.f32 1.0, %v1316_v52 }
 0x10b   : > { %v1243_v58 = vpack.c.bf16 %v470_v51, %v469_v53  ;;  %v467_v59 = vadd.f32 1.0, %v1318_v54 }
 0x10c   : > { %v472_v60 = vmul.f32 %v468_v56, %v440_v55 }
 0x10d   : > { %1244 = vmatpush3.bf16.msra.mxu0 %v1243_v58  ;;  %v471_v61 = vmul.f32 %v467_v59, %v439_v57 }
 0x10e   : > { %1245 = vmatprep.subr.bf16.mxu0 %v1404_v11 }
 0x10f   : > { %v1246_v62 = vpack.c.bf16 %v472_v60, %v471_v61 }
 0x111   : > { %1247 = vmatpush3.bf16.msra.mxu0 %v1246_v62 }
 0x112   : > { %1195 = vmatprep.subr.mxu0 %v1577_v63 }
 0x114   : > { %1193 = vmatmul.mubr.msk.f32.vlgmr.msra.gmra.mrb[4].mxu0 %vm478_vm2, %v1582_v1 }
 0x115   : > { %1196 = vmatpush3.msra.mxu0 %v1577_v63  ;;  %1197 = vmatprep.mubr.msk.f32.mxu0 %vm339_vm0, %v1507_v0 }
 0x116   : > { %1248 = vmatprep.subr.bf16.mxu0 %v1404_v11 }
 0x118   : > { %1198 = vmatmul.mubr.msk.f32.vlgmr.msra.gmra.mrb[6].mxu0 %vm339_vm0, %v1526_v6 }
 0x119   : > { %1200 = vmatprep.mubr.msk.f32.mxu0 %vm339_vm0, %v1539_v8 }
 0x11c   : > { %1201 = vmatmul.mubr.msk.f32.gmra.mrb[8].mxu0 %vm339_vm0, %v1553_v10 }
 0x11d   : > { %1211 = vmatprep.mubr.msk.f32.mxu0 %vm1405_vm1, %v1406_v12 }
 0x1e7   : > { %v548_v3 = vpop.f32.mrb[4].mxu0 }
 0x1e8   : > { %v549_v4 = vadd.f32 %v548_v3, %v1599_v2  ;;  %v1194_v0 = vpop.f32.mrb[5].mxu0 }
 0x1ea   : > { %v552_v5 = vadd.f32 %v549_v4, %v1542_v9 }
 0x1eb   : > { %v1199_v7 = vpop.f32.mrb[6].mxu0 }
 0x1ec   : > { %v626_v6 = vadd.f32 %v1199_v7, %v1567_v15  ;;  %v620_v16 = vpop.f32.mrb[7].mxu0  ;;  %v748_v8 = vsel %vm478_vm2, %v552_v5, 0.0 }
 0x1ed   : > { %v621_v17 = vadd.f32 %v620_v16, %v1563_v13  ;;  %749 = vadd.xlane.f32.xlu1 %v748_v8 }
 0x1ee   : > { %v644_v10 = vmul.f32 %v626_v6, %v626_v6  ;;  %v640_v39 = vmul.f32 0.5, %v626_v6 }
 0x1ef   : > { %v643_v18 = vmul.f32 %v621_v17, %v621_v17  ;;  %v1202_v19 = vpop.f32.mrb[8].mxu0  ;;  %v639_v41 = vmul.f32 0.5, %v621_v17 }
 0x1f0   : > { %v648_v20 = vmul.f32 %v644_v10, %v626_v6  ;;  %v636_v22 = vadd.f32 %v1202_v19, %v1571_v21  ;;  %v630_v23 = vpop.f32.mrb[9].mxu0 }
 0x1f1   : > { %v647_v24 = vmul.f32 %v643_v18, %v621_v17  ;;  %v631_v25 = vadd.f32 %v630_v23, %v1565_v14 }
 0x1f2   : > { %v652_v9 = vmul.f32 0.044715, %v648_v20  ;;  %v646_v26 = vmul.f32 %v636_v22, %v636_v22  ;;  %v642_v47 = vmul.f32 0.5, %v636_v22 }
 0x1f3   : > { %v651_v27 = vmul.f32 0.044715, %v647_v24  ;;  %v645_v15 = vmul.f32 %v631_v25, %v631_v25  ;;  %v641_v49 = vmul.f32 0.5, %v631_v25 }
 0x1f4   : > { %v656_v28 = vadd.f32 %v652_v9, %v626_v6  ;;  %v650_v29 = vmul.f32 %v646_v26, %v636_v22  ;;  %v1122_v9 = vld [vmem:[%s1747_s7 + $0x1] ss:$0 sm:$0xff] }
 0x1f5   : > { %v655_v30 = vadd.f32 %v651_v27, %v621_v17  ;;  %v649_v31 = vmul.f32 %v645_v15, %v631_v25 }
 0x1f6   : > { %v660_v13 = vmul.f32 0.7978846, %v656_v28  ;;  %v654_v32 = vmul.f32 0.044715, %v650_v29  ;;  %v1303_v29 = vld [vmem:[%s1746_s6] sm:$0xff]  }
 0x1f7   : > { %v659_v33 = vmul.f32 0.7978846, %v655_v30  ;;  %v653_v34 = vmul.f32 0.044715, %v649_v31  ;;  %1223 = vmatpush3.bf16.msra.mxu1 %v1303_v29  ;;  %v1304_v30 = vld [vmem:[%s1746_s6 + $0x8] sm:$0xff]   ;;  %v1305_v31 = vld [vmem:[%s1746_s6 + $0x10] sm:$0xff]  }
 0x1f8   : > { %1319 = vtanh.f32 %v660_v13  ;;  %v658_v35 = vadd.f32 %v654_v32, %v636_v22  ;;  %v1121_v22 = vld [vmem:[%s1747_s7] ss:$0 sm:$0xff]  ;;  %1224 = vmatprep.subr.bf16.mxu1 %v1406_v12  ;;  %v1306_v13 = vld [vmem:[%s1746_s6 + $0x18] sm:$0xff]  }
 0x1f9   : > { %1321 = vtanh.f32 %v659_v33  ;;  %v657_v21 = vadd.f32 %v653_v34, %v631_v25  ;;  %v1307_v32 = vld [vmem:[%s1746_s6 + $0x20] sm:$0xff]   ;;  %v1308_v33 = vld [vmem:[%s1746_s6 + $0x28] sm:$0xff]   ;;  %v1309_v34 = vld [vmem:[%s1746_s6 + $0x30] sm:$0xff]  }
 0x1fa   : > { %v662_v36 = vmul.f32 0.7978846, %v658_v35  ;;  %v1310_v35 = vld [vmem:[%s1746_s6 + $0x38] sm:$0xff]  }
 0x1fb   : > { %v661_v37 = vmul.f32 0.7978846, %v657_v21  ;;  %1225 = vmatpush3.bf16.msra.mxu1 %v1304_v30  ;;  %v1123_v21 = vld [vmem:[%s1745_s5] ss:$0 sm:$0xff]  ;;  %v1137_v30 = vld [vmem:[%s1747_s7 + $0x3] ss:$0 sm:$0xff] }
 0x1fc   : > { %1323 = vtanh.f32 %v662_v36  ;;  %1226 = vmatprep.subr.bf16.mxu1 %v1406_v12 }
 0x1fd   : > { %1325 = vtanh.f32 %v661_v37 }
 0x1ff   : > { %1227 = vmatpush3.bf16.msra.mxu1 %v1305_v31 }
 0x200   : > { %1228 = vmatprep.subr.bf16.mxu1 %v1406_v12 }
 0x202   : > { %v1320_v14 = vpop.eup %1319 }
 0x203   : > { %v1322_v38 = vpop.eup %1321  ;;  %v668_v40 = vadd.f32 1.0, %v1320_v14  ;;  %1229 = vmatpush3.bf16.msra.mxu1 %v1306_v13 }
 0x204   : > { %v667_v42 = vadd.f32 1.0, %v1322_v38  ;;  %1230 = vmatprep.subr.bf16.mxu1 %v1406_v12 }
 0x205   : > { %v672_v43 = vmul.f32 %v668_v40, %v640_v39 }
 0x206   : > { %v1324_v44 = vpop.eup %1323  ;;  %v671_v45 = vmul.f32 %v667_v42, %v639_v41 }
 0x207   : > { %v1326_v46 = vpop.eup %1325  ;;  %v670_v48 = vadd.f32 1.0, %v1324_v44  ;;  %1231 = vmatpush3.bf16.msra.mxu1 %v1307_v32 }
 0x208   : > { %v1249_v50 = vpack.c.bf16 %v672_v43, %v671_v45  ;;  %v669_v51 = vadd.f32 1.0, %v1326_v46  ;;  %1232 = vmatprep.subr.bf16.mxu1 %v1406_v12 }
 0x209   : > { %v674_v52 = vmul.f32 %v670_v48, %v642_v47 }
 0x20a   : > { %1250 = vmatpush3.bf16.msra.mxu0 %v1249_v50  ;;  %v673_v53 = vmul.f32 %v669_v51, %v641_v49 }
 0x20b   : > { %1251 = vmatprep.subr.bf16.mxu0 %v1404_v11  ;;  %1233 = vmatpush3.bf16.msra.mxu1 %v1308_v33 }
 0x20c   : > { %v1252_v54 = vpack.c.bf16 %v674_v52, %v673_v53  ;;  %1234 = vmatprep.subr.bf16.mxu1 %v1406_v12 }
 0x20e   : > { %1253 = vmatpush3.bf16.msra.mxu0 %v1252_v54 }
 0x20f   : > { %1214 = vmatprep.subr.bf16.mxu0 %v1406_v12  ;;  %1235 = vmatpush3.bf16.msra.mxu1 %v1309_v34 }
 0x210   : > { %1236 = vmatprep.subr.bf16.mxu1 %v1406_v12 }
 0x211   : > { %1212 = vmatmul.mubr.msk.f32.vlgmr.msra.gmra.mrb[10].mxu0 %vm478_vm2, %v1582_v1 }
 0x212   : > { %1218 = vmatprep.mubr.msk.bf16.mxu0 %vm1405_vm1, %v1406_v12 }
 0x213   : > { %1237 = vmatpush3.bf16.msra.mxu1 %v1310_v35 }
 0x27a   : > { %v750_v55 = vpop.xlane.xlu1 %749 }
 0x27b   : > { %v755_v56 = vmul.f32 0.03125, %v750_v55 }
 0x27d   : > { %v757_v58 = vsub.f32 %v552_v5, %v755_v56 }
 0x27f   : > { %v759_v62 = vmul.f32 %v757_v58, %v757_v58 }
 0x281   : > { %v761_v3 = vsel %vm478_vm2, %v759_v62, 0.0 }
 0x2e4   : > { %v741_v57 = vpop.f32.mrb[10].mxu0 }
 0x2e5   : > { %v742_v59 = vadd.f32 %v741_v57, %v1599_v2  ;;  %v1213_v60 = vpop.f32.mrb[11].mxu0  ;;  %v1301_v2 = vld [vmem:[%s1744_s4] sm:$0xff]  }
 0x2e6   : > { %1215 = vmatpush3.bf16.msra.mxu0 %v1301_v2 }
 0x2e7   : > { %v745_v61 = vadd.f32 %v742_v59, %v1577_v63  ;;  %1216 = vmatprep.subr.bf16.mxu0 %v1406_v12  ;;  %v1302_v63 = vld [vmem:[%s1744_s4 + $0x8] sm:$0xff]   ;;  %v1127_v59 = vld [vmem:[%s1747_s7 + $0x4] ss:$0 sm:$0xff] }
 0x2e9   : > { %v751_v11 = vsel %vm478_vm2, %v745_v61, 0.0 }
 0x2ea   : > { %752 = vadd.xlane.f32.xlu0 %v751_v11  ;;  %1217 = vmatpush3.bf16.msra.mxu0 %v1302_v63 }
 0x2ee   : > { %762 = vadd.xlane.f32.xlu0 %v761_v3 }
 0x377   : > { %v753_v1 = vpop.xlane.xlu0 %752 }
 0x378   : > { %v756_v4 = vmul.f32 0.03125, %v753_v1 }
 0x37a   : > { %v758_v0 = vsub.f32 %v745_v61, %v756_v4 }
 0x37b   : > { %v763_v5 = vpop.xlane.xlu0 %762 }
 0x37c   : > { %v760_v7 = vmul.f32 %v758_v0, %v758_v0  ;;  %v767_v16 = vmul.f32 0.03125, %v763_v5 }
 0x37e   : > { %v764_v6 = vsel %vm478_vm2, %v760_v7, 0.0  ;;  %v769_v8 = vadd.f32 1e-05, %v767_v16 }
 0x37f   : > { %765 = vadd.xlane.f32.xlu1 %v764_v6 }
 0x380   : > { %1327 = vrsqrt.f32 %v769_v8 }
 0x38a   : > { %v1328_v19 = vpop.eup %1327 }
 0x38b   : > { %v773_v20 = vmul.f32 %v1328_v19, %v757_v58 }
 0x38d   : > { %v779_v24 = vmul.f32 %v1121_v22, %v773_v20 }
 0x38f   : > { %v1632_v27 = vadd.f32 %v1122_v9, %v779_v24 }
 0x40c   : > { %v766_v17 = vpop.xlane.xlu1 %765 }
 0x40d   : > { %v768_v10 = vmul.f32 0.03125, %v766_v17 }
 0x40f   : > { %v770_v18 = vadd.f32 1e-05, %v768_v10 }
 0x411   : > { %1329 = vrsqrt.f32 %v770_v18 }
 0x41b   : > { %v1330_v23 = vpop.eup %1329 }
 0x41c   : > { %v774_v25 = vmul.f32 %v1330_v23, %v758_v0 }
 0x41e   : > { %v780_v26 = vmul.f32 %v1121_v22, %v774_v25 }
 0x420   : > { %v1634_v15 = vadd.f32 %v1122_v9, %v780_v26 }
 0x422   : > { %v787_v28 = vpack.c.bf16 %v1634_v15, %v1632_v27 }
 0x424   : > { %1219 = vmatmul.mubr.msk.bf16.vlgmr.msra.gmra.mrb[12].mxu0 %vm478_vm2, %v787_v28 }
 0x4f7   : > { %v848_v36 = vpop.f32.mrb[12].mxu0 }
 0x4f8   : > { %v849_v37 = vadd.f32 %v1123_v21, %v848_v36  ;;  %v1220_v14 = vpop.f32.mrb[13].mxu0 }
 0x4f9   : > { %v851_v38 = vpop.f32.mrb[14].mxu0 }
 0x4fa   : > { %v857_v39 = vmul.f32 %v849_v37, %v849_v37  ;;  %v852_v40 = vadd.f32 %v1123_v21, %v851_v38  ;;  %v1221_v41 = vpop.f32.mrb[15].mxu0  ;;  %v855_v53 = vmul.f32 0.5, %v849_v37 }
 0x4fc   : > { %v859_v42 = vmul.f32 %v857_v39, %v849_v37  ;;  %v858_v43 = vmul.f32 %v852_v40, %v852_v40  ;;  %v856_v54 = vmul.f32 0.5, %v852_v40 }
 0x4fe   : > { %v861_v44 = vmul.f32 0.044715, %v859_v42  ;;  %v860_v45 = vmul.f32 %v858_v43, %v852_v40 }
 0x500   : > { %v863_v46 = vadd.f32 %v861_v44, %v849_v37  ;;  %v862_v47 = vmul.f32 0.044715, %v860_v45 }
 0x502   : > { %v865_v48 = vmul.f32 0.7978846, %v863_v46  ;;  %v864_v12 = vadd.f32 %v862_v47, %v852_v40 }
 0x504   : > { %1331 = vtanh.f32 %v865_v48  ;;  %v866_v49 = vmul.f32 0.7978846, %v864_v12 }
 0x506   : > { %1333 = vtanh.f32 %v866_v49 }
 0x50e   : > { %v1332_v50 = vpop.eup %1331 }
 0x50f   : > { %v869_v51 = vadd.f32 1.0, %v1332_v50 }
 0x510   : > { %v1334_v52 = vpop.eup %1333 }
 0x511   : > { %v870_v55 = vadd.f32 1.0, %v1334_v52  ;;  %v871_v56 = vmul.f32 %v869_v51, %v855_v53 }
 0x513   : > { %v872_v57 = vmul.f32 %v870_v55, %v856_v54 }
 0x515   : > { %v873_v58 = vpack.c.bf16 %v872_v57, %v871_v56 }
 0x517   : > { %1239 = vmatmul.mubr.bf16.vlgmr.msra.gmra.mrb[0].mxu1 %v873_v58 }
 0x5ea   : > { %v977_v60 = vpop.f32.mrb[0].mxu1 }
 0x5eb   : > { %v978_v61 = vadd.f32 %v1127_v59, %v977_v60  ;;  %v1240_v11 = vpop.f32.mrb[1].mxu1 }
 0x5ec   : > { %v980_v62 = vpop.f32.mrb[2].mxu1 }
 0x5ed   : > { %v981_v3 = vadd.f32 %v1127_v59, %v980_v62  ;;  %v1241_v1 = vpop.f32.mrb[3].mxu1  ;;  %v984_v4 = vadd.f32 %v978_v61, %v1632_v27 }
 0x5ef   : > { %v988_v0 = vsel %vm478_vm2, %v984_v4, 0.0  ;;  %v985_v7 = vadd.f32 %v981_v3, %v1634_v15  ;;  %v1136_v15 = vld [vmem:[%s1747_s7 + $0x2] ss:$0 sm:$0xff] }
 0x5f0   : > { %989 = vadd.xlane.f32.xlu0 %v988_v0 }
 0x5f1   : > { %v991_v6 = vsel %vm478_vm2, %v985_v7, 0.0 }
 0x5f2   : > { %992 = vadd.xlane.f32.xlu1 %v991_v6 }
 0x67d   : > { %v990_v2 = vpop.xlane.xlu0 %989 }
 0x67e   : > { %v994_v63 = vmul.f32 0.03125, %v990_v2 }
 0x67f   : > { %v993_v5 = vpop.xlane.xlu1 %992 }
 0x680   : > { %v996_v16 = vsub.f32 %v984_v4, %v994_v63  ;;  %v995_v8 = vmul.f32 0.03125, %v993_v5 }
 0x682   : > { %v997_v17 = vsub.f32 %v985_v7, %v995_v8  ;;  %v998_v10 = vmul.f32 %v996_v16, %v996_v16 }
 0x684   : > { %v1000_v18 = vsel %vm478_vm2, %v998_v10, 0.0  ;;  %v999_v19 = vmul.f32 %v997_v17, %v997_v17 }
 0x685   : > { %1001 = vadd.xlane.f32.xlu0 %v1000_v18 }
 0x686   : > { %v1003_v20 = vsel %vm478_vm2, %v999_v19, 0.0 }
 0x687   : > { %1004 = vadd.xlane.f32.xlu1 %v1003_v20 }
 0x712   : > { %v1002_v22 = vpop.xlane.xlu0 %1001 }
 0x713   : > { %v1006_v23 = vmul.f32 0.03125, %v1002_v22 }
 0x714   : > { %v1005_v24 = vpop.xlane.xlu1 %1004 }
 0x715   : > { %v1008_v25 = vadd.f32 1e-05, %v1006_v23  ;;  %v1007_v9 = vmul.f32 0.03125, %v1005_v24 }
 0x717   : > { %1335 = vrsqrt.f32 %v1008_v25  ;;  %v1009_v26 = vadd.f32 1e-05, %v1007_v9 }
 0x719   : > { %1337 = vrsqrt.f32 %v1009_v26 }
 0x721   : > { %v1336_v27 = vpop.eup %1335 }
 0x722   : > { %v1012_v28 = vmul.f32 %v1336_v27, %v996_v16 }
 0x723   : > { %v1338_v29 = vpop.eup %1337 }
 0x724   : > { %v1018_v31 = vmul.f32 %v1136_v15, %v1012_v28  ;;  %v1013_v13 = vmul.f32 %v1338_v29, %v997_v17 }
 0x726   : > { %v1024_v32 = vadd.f32 %v1137_v30, %v1018_v31  ;;  %v1019_v33 = vmul.f32 %v1136_v15, %v1013_v13 }
 0x728   : > { %v1025_v34 = vadd.f32 %v1137_v30, %v1019_v33  ;;  %1026 = vst.msk [vmem:[%s299_s17] sm:$0xff] %vm478_vm2, %v1024_v32 }
 0x72a   : > { %1027 = vst.msk [vmem:[%s299_s17 + $0x8] sm:$0xff] %vm478_vm2, %v1025_v34 }
 0x72b   : > { %1352 = shalt.err (!%p1349_p3)
}
 0x72c   : > { %s1353_s19 = scalar_lea.hbm %s1693_s13, 256  ;;  %s1357_s25 = scalar_lea.hbm %s1748_s8, 512 }
 0x72d   : > { %p1354_p4 = scmp.ne.s32.totalorder %s1693_s13, %s1353_s19  ;;  %p1358_p9 = scmp.lt.u32.totalorder %s1693_s13, %s1748_s8 }
 0x72e   : > { %p1359_p10 = scmp.lt.u32.totalorder %s1357_s25, %s1353_s19  ;;  %p1361_p12 = scmp.lt.u32.totalorder %s1353_s19, %s1693_s13 }
 0x72f   : > { %p1355_p7 = pnand %p1354_p4, %p1493_p5 }
 0x730   : > { %p1360_p11 = por %p1359_p10, %p1358_p9 }
 0x731   : > { %p1356_p8 = pneg %p1355_p7 }
 0x732   : > { %p1362_p13 = por %p1361_p12, %p1360_p11 }
 0x734   : > { %p1363_p0 = pnand %p1362_p13, %p1356_p8 }
 0x736   : > { %1366 = shalt.err (!%p1363_p0)
}
 0x737   : > { %s1408_s12 = smov 128   ;;  %s1409_s18 = smov 8  }
 0x738   : > { %1254 = dma.vmem_to_hbm [thread:$0]  (%p1493_p5), %s1695_s26, 256, %s1693_s13, %s1699_s9, %s1408_s12, %s1408_s12, %s1409_s18  }
 0x739 PF: > { %p1260_p1 = scmp.ge.s32.totalorder %s1401_s30, 2  ;;  %s1057_s20 = sand.u32 1, %s1389_s27  }
 0x73a   : > { %s1058_s21 = scalar_lea.sflag [#allocation3], %s1057_s20 }
 0x73b   : > { %p1257_p2 = pnand %p1260_p1, %p1497_p6 }
 0x73d   : > { %1384 = dma.done.wait (!%p1257_p2), %s1058_s21, 256  }
 0x73e   : > { %1386 = vsyncadd (!%p1257_p2), %s1058_s21, 4294967040  ;;  %p18_p3 = scmp.ge.s32.totalorder %s1480_s11, 4   ;;  %s1751_s27 = smov %s1393_s28 }
 0x73f   : > { %s1752_s28 = smov %s1397_s29  ;;  %s1753_s29 = smov %s1491_s14 }
 0x740   : > { %s1754_s30 = smov %s1480_s11  ;;  %20 = sbr.rel (!%p18_p3) target bundleno = 3 (0x3), region = 87 }
 0x747   :  { %1063 = vsyncpa [#allocation3], 1 }
 0x748   :  { %1065 = vsyncpa [#allocation3 + $0x1], 1 }

</bundles_post_ra>
